<compile_context>
chip_gen: v5e
topology: v5e:2x2
jax: 0.10.0
libtpu: 0.0.40
codegen_flags: <defaults>
</compile_context>

<pallas_src>
import jax
import jax.numpy as jnp
from jax.experimental import pallas as pl
from jax.experimental.pallas import tpu as pltpu

SCALE = 1.0 / 0.6  # ScaledSiLU scale factor


def _round_up(a, b):
    return ((a + b - 1) // b) * b


def _sublanes_for(dtype):
    return {4: 8, 2: 16, 1: 32}.get(jnp.dtype(dtype).itemsize, 8)


def _vmem_cap_bytes():
    # Per-generation scoped-VMEM ceiling: ~40 MiB on v7x (64 MiB physical),
    # up to 64 MiB on v5e/v6e (128 MiB physical).  Conservative fallback if
    # the trace-time query is unavailable.
    try:
        phys = pltpu.get_tpu_info().vmem_capacity_bytes
    except Exception:
        return 32 << 20
    return int(min(64 << 20, max(32 << 20, int(phys * 0.65))))


def _sigmoid(x):
    # One EUP push (tanh) instead of exp + approx-reciprocal (two pushes),
    # and no approx-reciprocal error.  Stays in x.dtype (bf16-native on
    # v6e/v7x; Mosaic upcasts internally on v5e).
    return 0.5 * (jnp.tanh(x * 0.5) + 1.0)


# ----------------------------------------------------------------------------
# 1) Fused DenseLayer(activation='silu'): GEMM + bias + ScaledSiLU epilogue.
# ----------------------------------------------------------------------------
def _dense_ssilu_kernel(x_ref, w_ref, b_ref, o_ref):
    acc = jnp.dot(
        x_ref[...],
        w_ref[...],
        preferred_element_type=jnp.float32,
        precision=jax.lax.Precision.HIGHEST,
    )
    acc = acc + b_ref[...].astype(jnp.float32)
    # ScaledSiLU fused in the epilogue -> activation costs zero extra HBM.
    o_ref[...] = (acc * _sigmoid(acc) * SCALE).astype(o_ref.dtype)


def dense_scaled_silu(x, w, b, *, max_rows_per_block=512):
    """y = ScaledSiLU(x @ w + b); activation fused into the matmul epilogue."""
    M, K = x.shape
    K2, N = w.shape
    assert K == K2 and b.shape == (N,)
    sub = _sublanes_for(x.dtype)

    if M < sub:
        tm = M  # full-dim block (allowed even when not sublane-aligned)
    else:
        tm = min(_round_up(M, sub), max_rows_per_block)
    grid = (pl.cdiv(M, tm),)
    b2d = b.reshape(1, N)

    return pl.pallas_call(
        _dense_ssilu_kernel,
        out_shape=jax.ShapeDtypeStruct((M, N), x.dtype),
        grid_spec=pltpu.PrefetchScalarGridSpec(
            num_scalar_prefetch=0,
            grid=grid,
            in_specs=[
                pl.BlockSpec((tm, K), lambda i: (i, 0)),   # row tile of x
                pl.BlockSpec((K, N), lambda i: (0, 0)),    # full weight
                pl.BlockSpec((1, N), lambda i: (0, 0)),    # bias
            ],
            out_specs=pl.BlockSpec((tm, N), lambda i: (i, 0)),
        ),
        compiler_params=pltpu.CompilerParams(
            dimension_semantics=("parallel",),
        ),
    )(x, w, b2d)


# ----------------------------------------------------------------------------
# 2) Standalone ScaledSiLU (for activations without a Pallas producer).
# ----------------------------------------------------------------------------
def _scaled_silu_kernel(x_ref, o_ref):
    x = x_ref[...]
    if x.dtype == jnp.bfloat16:
        # bf16-native VPU/EUP on v6e/v7x (halves vreg pressure); Mosaic
        # upcasts internally on v5e, same numerics within bf16 tolerance.
        y = x * _sigmoid(x) * SCALE
    else:
        xf = x.astype(jnp.float32)
        y = xf * _sigmoid(xf) * SCALE
    o_ref[...] = y.astype(o_ref.dtype)


def _scaled_silu_xla(x):
    return (jax.nn.silu(x.astype(jnp.float32)) * SCALE).astype(x.dtype)


def _scaled_silu_flat_pallas(x_flat, *, target_block_bytes):
    """x_flat: 1-D, length a multiple of 128."""
    n = x_flat.shape[0]
    dtype = x_flat.dtype
    itemsize = jnp.dtype(dtype).itemsize
    sub = _sublanes_for(dtype)

    # Widest lane-dense slab: last dim a LARGE multiple of 128 -> unmasked
    # full-width vector stores.
    for lanes in (2048, 1024, 512, 256, 128):
        if n % lanes == 0:
            break
    rows = n // lanes
    x2d = x_flat.reshape(rows, lanes)

    # ~4 MiB blocks: per-grid-step overhead (~0.35 us) is a few % of the
    # block's HBM time even at v7x per-TC bandwidth.
    tile_rows = max(sub, (target_block_bytes // (lanes * itemsize)) // sub * sub)
    tile_rows = min(tile_rows, _round_up(rows, sub))
    n_blocks = pl.cdiv(rows, tile_rows)

    # v7x has 2 TensorCores: aim for >= 2 blocks per TC (so each TC can
    # overlap DMA-in / compute / DMA-out) and an even total (load balance).
    # Near-zero cost on v5e/v6e (single TC).
    if n_blocks < 4 and rows >= 4 * sub:
        tile_rows = _round_up(pl.cdiv(rows, 4), sub)
        n_blocks = pl.cdiv(rows, tile_rows)
    if n_blocks > 1 and n_blocks % 2 == 1:
        cand = _round_up(pl.cdiv(rows, n_blocks + 1), sub)
        if cand >= sub and pl.cdiv(rows, cand) % 2 == 0:
            tile_rows = cand
            n_blocks = pl.cdiv(rows, cand)

    block_bytes = tile_rows * lanes * itemsize
    # 2 double-buffered input blocks + 2 output blocks + headroom, capped by
    # the generation-appropriate scoped-VMEM ceiling.
    vmem_limit = int(min(_vmem_cap_bytes(), max(16 << 20, 6 * block_bytes)))

    out2d = pl.pallas_call(
        _scaled_silu_kernel,
        out_shape=jax.ShapeDtypeStruct((rows, lanes), dtype),
        grid_spec=pltpu.PrefetchScalarGridSpec(
            num_scalar_prefetch=0,
            grid=(n_blocks,),
            in_specs=[pl.BlockSpec((tile_rows, lanes), lambda i: (i, 0))],
            out_specs=pl.BlockSpec((tile_rows, lanes), lambda i: (i, 0)),
        ),
        compiler_params=pltpu.CompilerParams(
            dimension_semantics=("parallel",),
            vmem_limit_bytes=vmem_limit,
        ),
    )(x2d)
    return out2d.reshape(n)


def scaled_silu(x, *, min_pallas_elems=1 << 18, target_block_bytes=4 << 20):
    """ScaledSiLU applied elementwise to an array of any shape."""
    n = x.size
    if n == 0:
        return x
    if n < min_pallas_elems:
        # Small tensors: HBM traffic is well under the pallas_call launch +
        # grid overhead; let XLA fuse the elementwise op (often for free into
        # its producer).
        return _scaled_silu_xla(x)

    orig_shape = x.shape
    x_flat = jnp.ravel(x)
    n_main = (n // 128) * 128
    if n_main == n:
        out = _scaled_silu_flat_pallas(x_flat, target_block_bytes=target_block_bytes)
        return out.reshape(orig_shape)

    # Ragged tail (< 128 elems): Pallas on the 128-aligned prefix, tiny XLA
    # tail, single concatenate -- avoids the full-array pad and the
    # full-array slice of a pad-to-128 strategy.
    out_main = _scaled_silu_flat_pallas(
        x_flat[:n_main], target_block_bytes=target_block_bytes
    )
    out_tail = _scaled_silu_xla(x_flat[n_main:])
    return jnp.concatenate([out_main, out_tail]).reshape(orig_shape)


if __name__ == "__main__":
    key = jax.random.PRNGKey(0)
    k1, k2, k3, k4, k5, k6, k7 = jax.random.split(key, 7)

    def silu_ref(v):
        return (jax.nn.silu(v.astype(jnp.float32)) * SCALE).astype(v.dtype)

    # 1) Fused DenseLayer(activation='silu') at module-consistent sizes
    #    (Dynamics: hidden_nf=32, small node-feature widths, 64 nodes).
    n_nodes, in_f, hid = 64, 10, 32
    x = jax.random.normal(k1, (n_nodes, in_f), dtype=jnp.float32)
    w = jax.random.normal(k2, (in_f, hid), dtype=jnp.float32) * (1.0 / jnp.sqrt(in_f))
    b = jax.random.normal(k3, (hid,), dtype=jnp.float32) * 0.1
    y = dense_scaled_silu(x, w, b)
    jax.block_until_ready(y)
    ref = jax.nn.silu(
        jnp.dot(x, w, precision=jax.lax.Precision.HIGHEST) + b
    ) * SCALE
    assert y.shape == (n_nodes, hid) and y.dtype == x.dtype
    assert jnp.allclose(y, ref, atol=1e-4, rtol=1e-4)

    # 2) Standalone ScaledSiLU, tiny tensor -> XLA-fallback path (exact).
    xs = jax.random.normal(k4, (2, 4, 16, 16), dtype=jnp.float32)
    ys = scaled_silu(xs)
    jax.block_until_ready(ys)
    assert ys.shape == xs.shape and ys.dtype == xs.dtype
    assert jnp.allclose(ys, silu_ref(xs), atol=1e-5, rtol=1e-5)

    # 3) Pallas path: lane-dense (2048-wide) slab, 4 even blocks, no padding.
    xb = jax.random.normal(k5, (512, 1024), dtype=jnp.float32)
    yb = scaled_silu(xb, min_pallas_elems=1 << 14)
    jax.block_until_ready(yb)
    assert yb.shape == xb.shape and yb.dtype == xb.dtype
    assert jnp.allclose(yb, silu_ref(xb), atol=1e-4, rtol=1e-4)

    # 4) Ragged flat size -> copy-free 128-aligned prefix + tiny XLA tail.
    xr = jax.random.normal(k6, (1000, 130), dtype=jnp.float32)
    yr = scaled_silu(xr, min_pallas_elems=1 << 14)
    jax.block_until_ready(yr)
    assert yr.shape == xr.shape
    assert jnp.allclose(yr, silu_ref(xr), atol=1e-4, rtol=1e-4)

    # 5) bf16 Pallas path (bf16-native compute, 16-row sublane packing).
    xh = jax.random.normal(k7, (256, 512), dtype=jnp.bfloat16)
    yh = scaled_silu(xh, min_pallas_elems=1 << 14)
    jax.block_until_ready(yh)
    assert yh.shape == xh.shape and yh.dtype == xh.dtype
    assert jnp.allclose(
        yh.astype(jnp.float32), silu_ref(xh).astype(jnp.float32),
        atol=2e-2, rtol=2e-2,
    )

    print("KERNEL_OK")
</pallas_src>

<mosaic_0001>
module attributes {stable_mosaic.version = 11 : i64} {
  func.func @_dense_ssilu_kernel(%arg0: i32, %arg1: memref<64x10xf32, #tpu.memory_space<vmem>>, %arg2: memref<10x32xf32, #tpu.memory_space<vmem>>, %arg3: memref<1x32xf32, #tpu.memory_space<vmem>>, %arg4: memref<64x32xf32, #tpu.memory_space<vmem>>) attributes {dimension_semantics = [#tpu.dimension_semantics<parallel>], iteration_bounds = array<i64: 1>, scalar_prefetch = 0 : i64, scratch_operands = 0 : i64, tpu.core_type = #tpu.core_type<tc>, window_params = [{transform_indices = @transform_0, window_bounds = array<i64: 64, 10>}, {pipeline_mode = #tpu.pipeline_mode<synchronous>, transform_indices = @transform_1, window_bounds = array<i64: 10, 32>}, {pipeline_mode = #tpu.pipeline_mode<synchronous>, transform_indices = @transform_2, window_bounds = array<i64: 1, 32>}, {transform_indices = @transform_3, window_bounds = array<i64: 64, 32>}]} {
    %c0 = arith.constant 0 : index
    %c0_0 = arith.constant 0 : index
    %0 = vector.load %arg1[%c0, %c0_0] : memref<64x10xf32, #tpu.memory_space<vmem>>, vector<64x10xf32>
    %c0_1 = arith.constant 0 : index
    %c0_2 = arith.constant 0 : index
    %1 = vector.load %arg2[%c0_1, %c0_2] : memref<10x32xf32, #tpu.memory_space<vmem>>, vector<10x32xf32>
    %cst = arith.constant dense<0.000000e+00> : vector<64x32xf32>
    %2 = tpu.matmul %0, %1, %cst {dimension_numbers = #tpu.dot_dimension_numbers<[1], [0], [0], [1], [0, 0, 1, 1], [], []>, precision = #tpu.contract_precision<fp32>} : vector<64x10xf32>, vector<10x32xf32>, vector<64x32xf32> -> vector<64x32xf32>
    %c0_3 = arith.constant 0 : index
    %c0_4 = arith.constant 0 : index
    %3 = vector.load %arg3[%c0_3, %c0_4] : memref<1x32xf32, #tpu.memory_space<vmem>>, vector<1x32xf32>
    %4 = vector.broadcast %3 : vector<1x32xf32> to vector<64x32xf32>
    %5 = arith.addf %2, %4 : vector<64x32xf32>
    %cst_5 = arith.constant 5.000000e-01 : f32
    %6 = vector.broadcast %cst_5 : f32 to vector<64x32xf32>
    %7 = arith.mulf %5, %6 : vector<64x32xf32>
    %8 = math.tanh %7 : vector<64x32xf32>
    %cst_6 = arith.constant 1.000000e+00 : f32
    %9 = vector.broadcast %cst_6 : f32 to vector<64x32xf32>
    %10 = arith.addf %8, %9 : vector<64x32xf32>
    %cst_7 = arith.constant 5.000000e-01 : f32
    %11 = vector.broadcast %cst_7 : f32 to vector<64x32xf32>
    %12 = arith.mulf %11, %10 : vector<64x32xf32>
    %13 = arith.mulf %5, %12 : vector<64x32xf32>
    %cst_8 = arith.constant 1.66666663 : f32
    %14 = vector.broadcast %cst_8 : f32 to vector<64x32xf32>
    %15 = arith.mulf %13, %14 : vector<64x32xf32>
    %c0_9 = arith.constant 0 : index
    %c0_10 = arith.constant 0 : index
    %16 = vector.load %arg4[%c0_9, %c0_10] : memref<64x32xf32, #tpu.memory_space<vmem>>, vector<64x32xf32>
    tpu.vector_store %arg4[%c0_9, %c0_10], %15 {strides = array<i32>} : memref<64x32xf32, #tpu.memory_space<vmem>>, vector<64x32xf32>,
    return
  }
  func.func @transform_0(%arg0: i32) -> (i32, i32) {
    %c0_i32 = arith.constant 0 : i32
    %c0_i32_0 = arith.constant 0 : i32
    return %arg0, %c0_i32 : i32, i32
  }
  func.func @transform_1(%arg0: i32) -> (i32, i32) {
    %c0_i32 = arith.constant 0 : i32
    %c0_i32_0 = arith.constant 0 : i32
    %c0_i32_1 = arith.constant 0 : i32
    return %c0_i32, %c0_i32_0 : i32, i32
  }
  func.func @transform_2(%arg0: i32) -> (i32, i32) {
    %c0_i32 = arith.constant 0 : i32
    %c0_i32_0 = arith.constant 0 : i32
    %c0_i32_1 = arith.constant 0 : i32
    return %c0_i32, %c0_i32_0 : i32, i32
  }
  func.func @transform_3(%arg0: i32) -> (i32, i32) {
    %c0_i32 = arith.constant 0 : i32
    %c0_i32_0 = arith.constant 0 : i32
    return %arg0, %c0_i32 : i32, i32
  }
}

</mosaic_0001>

<bundles_post_ra>
// kernel: tpu_custom_call.1
= control target key start
LH: loop header
LB: loop body
LE: loop exit
PB: predicated region body
PF: predicated region fallthrough
CT: control target
= control target key end

     0   :  { %vm53_vm0 = vcmask 1041408   ;;  %vm28_vm1 = vcmask 80896   ;;  %vm481_vm2 = vcmask 261120   ;;  %s720_s1 = inlined_call_operand.vmem [shape: f32[10,32], index: 1, kind: input, shape index: {}]   ;;  %s721_s0 = inlined_call_operand.vmem [shape: f32[64,10], index: 0, kind: input, shape index: {}]   ;;  %s722_s2 = inlined_call_operand.vmem [shape: f32[1,32], index: 2, kind: input, shape index: {}]   ;;  %s723_s3 = inlined_call_operand.vmem [shape: f32[64,32], index: 3, kind: output, shape index: {}]  }
   0x1   :  { %v23_v0 = vld [vmem:[%s720_s1 + $0x8] sm:$0x3]  ;;  %v22_v1 = vld [vmem:[%s720_s1] sm:$0xff]  ;;  %v20_v8 = vld [vmem:[%s721_s0 + $0x30] sm:$0xff] }
   0x2   :  { %v18_v2 = vld [vmem:[%s721_s0 + $0x20] sm:$0xff]  ;;  %v55_v3 = vsel %vm53_vm0, %v23_v0, 0  ;;  %v544_v4 = vand.u32 4294901760, %v22_v1  ;;  %v19_v6 = vld [vmem:[%s721_s0 + $0x28] sm:$0xff]  ;;  %v48_v19 = vsel %vm28_vm1, %v20_v8, 0  ;;  %v16_v34 = vld [vmem:[%s721_s0 + $0x10] sm:$0xff] }
   0x3   :  { %v42_v5 = vsel %vm28_vm1, %v18_v2, 0  ;;  %v14_v7 = vld [vmem:[%s721_s0] sm:$0xff]  ;;  %v71_v9 = vand.u32 4294901760, %v55_v3  ;;  %v45_v11 = vsel %vm28_vm1, %v19_v6, 0  ;;  %v15_v13 = vld [vmem:[%s721_s0 + $0x8] sm:$0xff]  ;;  %v592_v33 = vand.u32 4294901760, %v48_v19 }
   0x4   :  { %v556_v10 = vand.u32 4294901760, %v42_v5  ;;  %v30_v12 = vsel %vm28_vm1, %v14_v7, 0  ;;  %v161_v14 = vsub.f32 %v22_v1, %v544_v4  ;;  %v564_v15 = vand.u32 4294901760, %v45_v11  ;;  %v21_v40 = vld [vmem:[%s721_s0 + $0x38] sm:$0xff] }
   0x5   :  { %v566_v16 = vand.u32 4294901760, %v30_v12  ;;  %494 = vmatpush.msra.mxu2 %v71_v9  ;;  %v155_v18 = vsub.f32 %v55_v3, %v71_v9  ;;  %72 = vmatpush.msra.mxu0 %v71_v9  ;;  %v33_v20 = vsel %vm28_vm1, %v15_v13, 0  ;;  %v36_v42 = vsel %vm28_vm1, %v16_v34, 0  ;;  %v17_v43 = vld [vmem:[%s721_s0 + $0x18] sm:$0xff] }
   0x6   :  { %v569_v17 = vsub.f32 %v42_v5, %v556_v10  ;;  %v162_v21 = vand.u32 4294901760, %v161_v14  ;;  %v574_v22 = vsub.f32 %v45_v11, %v564_v15  ;;  %v579_v24 = vand.u32 4294901760, %v33_v20 }
   0x7   :  { %v577_v23 = vsub.f32 %v30_v12, %v566_v16  ;;  %495 = vmatpush.msra.mxu2 %v544_v4  ;;  %v156_v26 = vand.u32 4294901760, %v155_v18  ;;  %74 = vmatpush.msra.mxu0 %v544_v4  ;;  %v612_v45 = vsub.f32 %v48_v19, %v592_v33  ;;  %v91_v46 = vand.u32 4294901760, %v36_v42 }
   0x8   :  { %v109_v25 = vand.u32 4294901760, %v569_v17  ;;  %v163_v27 = vsub.f32 %v161_v14, %v162_v21  ;;  %v586_v29 = vsub.f32 %v33_v20, %v579_v24  ;;  %v117_v32 = vand.u32 4294901760, %v574_v22  ;;  %v668_v20 = vld [vmem:[%s722_s2] ss:$0 sm:$0xff] }
   0x9   :  { %215 = vmatpush.msrb.mxu2 %v155_v18  ;;  %v77_v28 = vand.u32 4294901760, %v577_v23  ;;  %v157_v31 = vsub.f32 %v155_v18, %v156_v26  ;;  %344 = vmatpush.msrb.mxu0 %v156_v26  ;;  %v51_v48 = vsel %vm28_vm1, %v21_v40, 0  ;;  %v92_v49 = vsub.f32 %v36_v42, %v91_v46 }
   0xa   :  { %v110_v30 = vsub.f32 %v569_v17, %v109_v25  ;;  %v85_v36 = vand.u32 4294901760, %v586_v29  ;;  %v164_v39 = vand.u32 4294901760, %v163_v27  ;;  %v118_v44 = vsub.f32 %v574_v22, %v117_v32 }
   0xb   :  { %v78_v35 = vsub.f32 %v577_v23, %v77_v28  ;;  %218 = vmatpush.msrb.mxu2 %v161_v14  ;;  %v158_v38 = vand.u32 4294901760, %v157_v31  ;;  %348 = vmatpush.msrb.mxu0 %v162_v21  ;;  %v39_v50 = vsel %vm28_vm1, %v17_v43, 0  ;;  %v125_v52 = vand.u32 4294901760, %v612_v45 }
   0xc   :  { %v111_v37 = vand.u32 4294901760, %v110_v30  ;;  %v86_v47 = vsub.f32 %v586_v29, %v85_v36  ;;  %v119_v51 = vand.u32 4294901760, %v118_v44  ;;  %v131_v53 = vand.u32 4294901760, %v51_v48 }
   0xd   :  { %v79_v41 = vand.u32 4294901760, %v78_v35  ;;  %496 = vmatpush.msra.mxu3 %v158_v38  ;;  %159 = vmatpush.msra.mxu1 %v158_v38  ;;  %v93_v55 = vand.u32 4294901760, %v92_v49  ;;  %v99_v56 = vand.u32 4294901760, %v39_v50  ;;  %v126_v57 = vsub.f32 %v612_v45, %v125_v52 }
   0xe   :  { %112 = vmatmul.f32.vlgmr.msra.gmra.mxu2 %v111_v37  ;;  %v87_v54 = vand.u32 4294901760, %v86_v47  ;;  %v132_v58 = vsub.f32 %v51_v48, %v131_v53 }
   0xf   :  { %80 = vmatmul.f32.vlgmr.msra.gmra.mxu0 %v79_v41  ;;  %497 = vmatpush.msra.mxu3 %v164_v39  ;;  %v94_v59 = vsub.f32 %v92_v49, %v93_v55  ;;  %v100_v60 = vsub.f32 %v39_v50, %v99_v56  ;;  %v127_v61 = vand.u32 4294901760, %v126_v57 }
  0x10   :  { %183 = vmatmul.f32.vlgmr.msra.gmra.mxu3 %v556_v10  ;;  %165 = vmatpush.msra.mxu1 %v164_v39  ;;  %v133_v62 = vand.u32 4294901760, %v132_v58 }
  0x11   :  { %275 = vmatpush.msrb.mxu3 %v71_v9  ;;  %167 = vmatmul.f32.vlgmr.msra.gmra.mxu1 %v566_v16  ;;  %v95_v63 = vand.u32 4294901760, %v94_v59  ;;  %v101_v0 = vand.u32 4294901760, %v100_v60 }
  0x12   :  { %397 = vmatpush.msrb.mxu1 %v71_v9  ;;  %v134_v1 = vsub.f32 %v132_v58, %v133_v62 }
  0x13   :  { %277 = vmatpush.msrb.mxu3 %v544_v4  ;;  %v102_v2 = vsub.f32 %v100_v60, %v101_v0 }
  0x14   :  { %399 = vmatpush.msrb.mxu1 %v544_v4  ;;  %v135_v3 = vand.u32 4294901760, %v134_v1 }
  0x15   :  { %v103_v4 = vand.u32 4294901760, %v102_v2 }
  0x16   :  { %120 = vmatmul.f32.gmra.mxu2 %v119_v51 }
  0x17   :  { %88 = vmatmul.f32.gmra.mxu0 %v87_v54 }
  0x18   :  { %187 = vmatmul.f32.gmra.mxu3 %v564_v15 }
  0x19   :  { %171 = vmatmul.f32.gmra.mxu1 %v579_v24 }
  0x1e   :  { %128 = vmatmul.f32.gmra.mxu2 %v127_v61 }
  0x1f   :  { %96 = vmatmul.f32.gmra.mxu0 %v95_v63 }
  0x20   :  { %191 = vmatmul.f32.gmra.mxu3 %v592_v33 }
  0x21   :  { %175 = vmatmul.f32.gmra.mxu1 %v91_v46 }
  0x26   :  { %136 = vmatmul.f32.gmra.mxu2 %v135_v3 }
  0x27   :  { %104 = vmatmul.f32.gmra.mxu0 %v103_v4 }
  0x28   :  { %195 = vmatmul.f32.gmra.mxu3 %v131_v53 }
  0x29   :  { %179 = vmatmul.f32.gmra.mxu1 %v99_v56 }
  0x2e   :  { %221 = vmatmul.f32.vlgmr.msrb.gmra.mxu2 %v577_v23 }
  0x2f   :  { %350 = vmatmul.f32.vlgmr.msrb.gmra.mxu0 %v566_v16 }
  0x30   :  { %281 = vmatmul.f32.vlgmr.msrb.gmra.mxu3 %v77_v28 }
  0x31   :  { %401 = vmatmul.f32.vlgmr.msrb.gmra.mxu1 %v566_v16 }
  0x36   :  { %226 = vmatmul.f32.gmra.mxu2 %v586_v29 }
  0x37   :  { %354 = vmatmul.f32.gmra.mxu0 %v579_v24 }
  0x38   :  { %287 = vmatmul.f32.gmra.mxu3 %v85_v36 }
  0x39   :  { %405 = vmatmul.f32.gmra.mxu1 %v579_v24 }
  0x3e   :  { %231 = vmatmul.f32.gmra.mxu2 %v92_v49 }
  0x3f   :  { %358 = vmatmul.f32.gmra.mxu0 %v91_v46 }
  0x40   :  { %293 = vmatmul.f32.gmra.mxu3 %v93_v55 }
  0x41   :  { %409 = vmatmul.f32.gmra.mxu1 %v91_v46 }
  0x46   :  { %236 = vmatmul.f32.gmra.mxu2 %v100_v60 }
  0x47   :  { %362 = vmatmul.f32.gmra.mxu0 %v99_v56 }
  0x48   :  { %299 = vmatmul.f32.gmra.mxu3 %v101_v0 }
  0x49   :  { %413 = vmatmul.f32.gmra.mxu1 %v99_v56 }
  0x4e   :  { %241 = vmatmul.f32.gmra.mxu2 %v569_v17 }
  0x4f   :  { %366 = vmatmul.f32.gmra.mxu0 %v556_v10 }
  0x50   :  { %305 = vmatmul.f32.gmra.mxu3 %v109_v25 }
  0x51   :  { %417 = vmatmul.f32.gmra.mxu1 %v556_v10 }
  0x56   :  { %246 = vmatmul.f32.gmra.mxu2 %v574_v22 }
  0x57   :  { %370 = vmatmul.f32.gmra.mxu0 %v564_v15 }
  0x58   :  { %311 = vmatmul.f32.gmra.mxu3 %v117_v32 }
  0x59   :  { %421 = vmatmul.f32.gmra.mxu1 %v564_v15 }
  0x5e   :  { %251 = vmatmul.f32.gmra.mxu2 %v612_v45 }
  0x5f   :  { %374 = vmatmul.f32.gmra.mxu0 %v592_v33 }
  0x60   :  { %317 = vmatmul.f32.gmra.mxu3 %v125_v52 }
  0x61   :  { %425 = vmatmul.f32.gmra.mxu1 %v592_v33 }
  0x66   :  { %256 = vmatmul.f32.gmra.mxu2 %v132_v58 }
  0x67   :  { %378 = vmatmul.f32.gmra.mxu0 %v131_v53 }
  0x68   :  { %323 = vmatmul.f32.gmra.mxu3 %v133_v62 }
  0x69   :  { %429 = vmatmul.f32.gmra.mxu1 %v131_v53 }
  0x8c   :  { %v81_v5 = vpop.f32.mrf.mxu0 }
  0x8d   :  { %v82_v21 = vadd.f32 %v668_v20, %v81_v5 }
  0x8e   :  { %v168_v6 = vpop.f32.mrf.mxu1 }
  0x8f   :  { %v169_v25 = vadd.f32 %v168_v6, %v82_v21 }
  0x91   :  { %v651_v7 = vpop.f32.mrf.mxu2 }
  0x92   :  { %v114_v3 = vadd.f32 %v668_v20, %v651_v7 }
  0x93   :  { %v653_v8 = vpop.f32.mrf.mxu3 }
  0x94   :  { %v89_v9 = vpop.f32.mrf.mxu0 }
  0x95   :  { %v90_v28 = vadd.f32 %v668_v20, %v89_v9 }
  0x96   :  { %v172_v10 = vpop.f32.mrf.mxu1 }
  0x97   :  { %v173_v34 = vadd.f32 %v172_v10, %v90_v28 }
  0x99   :  { %v655_v11 = vpop.f32.mrf.mxu2 }
  0x9b   :  { %v657_v12 = vpop.f32.mrf.mxu3 }
  0x9c   :  { %v97_v13 = vpop.f32.mrf.mxu0 }
  0x9d   :  { %v98_v39 = vadd.f32 %v668_v20, %v97_v13 }
  0x9e   :  { %v176_v14 = vpop.f32.mrf.mxu1 }
  0x9f   :  { %v177_v45 = vadd.f32 %v176_v14, %v98_v39  ;;  %v185_v14 = vadd.f32 %v653_v8, %v114_v3 }
  0xa1   :  { %v659_v15 = vpop.f32.mrf.mxu2 }
  0xa3   :  { %v661_v16 = vpop.f32.mrf.mxu3 }
  0xa4   :  { %v105_v17 = vpop.f32.mrf.mxu0 }
  0xa5   :  { %v106_v51 = vadd.f32 %v668_v20, %v105_v17 }
  0xa6   :  { %v180_v18 = vpop.f32.mrf.mxu1 }
  0xa7   :  { %v181_v59 = vadd.f32 %v180_v18, %v106_v51 }
  0xa9   :  { %v663_v19 = vpop.f32.mrf.mxu2 }
  0xab   :  { %v671_v22 = vpop.f32.mrf.mxu3 }
  0xac   :  { %v351_v23 = vpop.f32.mrf.mxu0 }
  0xae   :  { %v402_v24 = vpop.f32.mrf.mxu1 }
  0xb1   :  { %v222_v26 = vpop.f32.mrf.mxu2 }
  0xb2   :  { %v223_v27 = vadd.f32 %v222_v26, %v169_v25 }
  0xb3   :  { %v282_v29 = vpop.f32.mrf.mxu3 }
  0xb4   :  { %v355_v30 = vpop.f32.mrf.mxu0  ;;  %v283_v31 = vadd.f32 %v282_v29, %v223_v27  ;;  %v122_v27 = vadd.f32 %v668_v20, %v655_v11 }
  0xb6   :  { %v352_v32 = vadd.f32 %v351_v23, %v283_v31  ;;  %v406_v33 = vpop.f32.mrf.mxu1 }
  0xb8   :  { %v403_v35 = vadd.f32 %v402_v24, %v352_v32  ;;  %v189_v32 = vadd.f32 %v657_v12, %v122_v27 }
  0xb9   :  { %v227_v36 = vpop.f32.mrf.mxu2 }
  0xba   :  { %v228_v37 = vadd.f32 %v227_v36, %v173_v34  ;;  %v433_v38 = vmul.f32 0.5, %v403_v35 }
  0xbb   :  { %v288_v40 = vpop.f32.mrf.mxu3 }
  0xbc   :  { %v359_v41 = vpop.f32.mrf.mxu0  ;;  %499 = vtanh.f32 %v433_v38  ;;  %v289_v42 = vadd.f32 %v288_v40, %v228_v37 }
  0xbe   :  { %v356_v43 = vadd.f32 %v355_v30, %v289_v42  ;;  %v410_v44 = vpop.f32.mrf.mxu1 }
  0xc0   :  { %v407_v46 = vadd.f32 %v406_v33, %v356_v43 }
  0xc1   :  { %v232_v47 = vpop.f32.mrf.mxu2 }
  0xc2   :  { %v233_v48 = vadd.f32 %v232_v47, %v177_v45  ;;  %v500_v49 = vpop.eup %499  ;;  %v434_v50 = vmul.f32 0.5, %v407_v46 }
  0xc3   :  { %v449_v52 = vadd.f32 1.0, %v500_v49  ;;  %v294_v53 = vpop.f32.mrf.mxu3 }
  0xc4   :  { %v363_v54 = vpop.f32.mrf.mxu0  ;;  %501 = vtanh.f32 %v434_v50  ;;  %v295_v55 = vadd.f32 %v294_v53, %v233_v48 }
  0xc5   :  { %v457_v56 = vmul.f32 0.5, %v449_v52 }
  0xc6   :  { %v360_v57 = vadd.f32 %v359_v41, %v295_v55  ;;  %v414_v58 = vpop.f32.mrf.mxu1  ;;  %v130_v41 = vadd.f32 %v668_v20, %v659_v15 }
  0xc7   :  { %v465_v60 = vmul.f32 %v457_v56, %v403_v35 }
  0xc8   :  { %v411_v61 = vadd.f32 %v410_v44, %v360_v57 }
  0xc9   :  { %v237_v62 = vpop.f32.mrf.mxu2  ;;  %v473_v63 = vmul.f32 1.6666666, %v465_v60 }
  0xca   :  { %v238_v0 = vadd.f32 %v237_v62, %v181_v59  ;;  %v502_v1 = vpop.eup %501  ;;  %v435_v2 = vmul.f32 0.5, %v411_v61 }
  0xcb   :  { %482 = vst.msk [vmem:[%s723_s3] sm:$0xff] %vm481_vm2, %v473_v63  ;;  %v450_v4 = vadd.f32 1.0, %v502_v1  ;;  %v300_v5 = vpop.f32.mrf.mxu3 }
  0xcc   :  { %503 = vtanh.f32 %v435_v2  ;;  %v301_v6 = vadd.f32 %v300_v5, %v238_v0  ;;  %v367_v10 = vpop.f32.mrf.mxu0 }
  0xcd   :  { %v458_v9 = vmul.f32 0.5, %v450_v4 }
  0xce   :  { %v364_v13 = vadd.f32 %v363_v54, %v301_v6  ;;  %v418_v18 = vpop.f32.mrf.mxu1  ;;  %v138_v54 = vadd.f32 %v668_v20, %v663_v19 }
  0xcf   :  { %v466_v17 = vmul.f32 %v458_v9, %v407_v46  ;;  %v193_v46 = vadd.f32 %v661_v16, %v130_v41 }
  0xd0   :  { %v415_v21 = vadd.f32 %v414_v58, %v364_v13  ;;  %v197_v60 = vadd.f32 %v671_v22, %v138_v54 }
  0xd1   :  { %v242_v23 = vpop.f32.mrf.mxu2  ;;  %v474_v24 = vmul.f32 1.6666666, %v466_v17 }
  0xd2   :  { %v243_v7 = vadd.f32 %v242_v23, %v185_v14  ;;  %v504_v25 = vpop.eup %503  ;;  %v436_v26 = vmul.f32 0.5, %v415_v21 }
  0xd3   :  { %483 = vst.msk [vmem:[%s723_s3 + $0x8] sm:$0xff] %vm481_vm2, %v474_v24  ;;  %v451_v28 = vadd.f32 1.0, %v504_v25  ;;  %v306_v29 = vpop.f32.mrf.mxu3 }
  0xd4   :  { %505 = vtanh.f32 %v436_v26  ;;  %v307_v8 = vadd.f32 %v306_v29, %v243_v7  ;;  %v371_v34 = vpop.f32.mrf.mxu0 }
  0xd5   :  { %v459_v30 = vmul.f32 0.5, %v451_v28 }
  0xd6   :  { %v368_v31 = vadd.f32 %v367_v10, %v307_v8  ;;  %v422_v11 = vpop.f32.mrf.mxu1 }
  0xd7   :  { %v467_v33 = vmul.f32 %v459_v30, %v411_v61 }
  0xd8   :  { %v419_v35 = vadd.f32 %v418_v18, %v368_v31 }
  0xd9   :  { %v247_v36 = vpop.f32.mrf.mxu2  ;;  %v475_v37 = vmul.f32 1.6666666, %v467_v33 }
  0xda   :  { %v248_v38 = vadd.f32 %v247_v36, %v189_v32  ;;  %v506_v39 = vpop.eup %505  ;;  %v437_v40 = vmul.f32 0.5, %v419_v35 }
  0xdb   :  { %484 = vst.msk [vmem:[%s723_s3 + $0x10] sm:$0xff] %vm481_vm2, %v475_v37  ;;  %v452_v42 = vadd.f32 1.0, %v506_v39  ;;  %v312_v43 = vpop.f32.mrf.mxu3 }
  0xdc   :  { %507 = vtanh.f32 %v437_v40  ;;  %v313_v12 = vadd.f32 %v312_v43, %v248_v38  ;;  %v375_v52 = vpop.f32.mrf.mxu0 }
  0xdd   :  { %v460_v44 = vmul.f32 0.5, %v452_v42 }
  0xde   :  { %v372_v45 = vadd.f32 %v371_v34, %v313_v12  ;;  %v426_v57 = vpop.f32.mrf.mxu1 }
  0xdf   :  { %v468_v47 = vmul.f32 %v460_v44, %v415_v21 }
  0xe0   :  { %v423_v48 = vadd.f32 %v422_v11, %v372_v45 }
  0xe1   :  { %v252_v49 = vpop.f32.mrf.mxu2  ;;  %v476_v50 = vmul.f32 1.6666666, %v468_v47 }
  0xe2   :  { %v253_v51 = vadd.f32 %v252_v49, %v193_v46  ;;  %v508_v15 = vpop.eup %507  ;;  %v438_v53 = vmul.f32 0.5, %v423_v48 }
  0xe3   :  { %485 = vst.msk [vmem:[%s723_s3 + $0x18] sm:$0xff] %vm481_vm2, %v476_v50  ;;  %v453_v55 = vadd.f32 1.0, %v508_v15  ;;  %v318_v56 = vpop.f32.mrf.mxu3 }
  0xe4   :  { %509 = vtanh.f32 %v438_v53  ;;  %v319_v16 = vadd.f32 %v318_v56, %v253_v51  ;;  %v379_v4 = vpop.f32.mrf.mxu0 }
  0xe5   :  { %v461_v58 = vmul.f32 0.5, %v453_v55 }
  0xe6   :  { %v376_v59 = vadd.f32 %v375_v52, %v319_v16  ;;  %v430_v9 = vpop.f32.mrf.mxu1 }
  0xe7   :  { %v469_v61 = vmul.f32 %v461_v58, %v419_v35 }
  0xe8   :  { %v427_v62 = vadd.f32 %v426_v57, %v376_v59 }
  0xe9   :  { %v257_v63 = vpop.f32.mrf.mxu2  ;;  %v477_v0 = vmul.f32 1.6666666, %v469_v61 }
  0xea   :  { %v258_v1 = vadd.f32 %v257_v63, %v197_v60  ;;  %v510_v19 = vpop.eup %509  ;;  %v439_v20 = vmul.f32 0.5, %v427_v62 }
  0xeb   :  { %486 = vst.msk [vmem:[%s723_s3 + $0x20] sm:$0xff] %vm481_vm2, %v477_v0  ;;  %v454_v2 = vadd.f32 1.0, %v510_v19  ;;  %v324_v3 = vpop.f32.mrf.mxu3 }
  0xec   :  { %511 = vtanh.f32 %v439_v20  ;;  %v325_v5 = vadd.f32 %v324_v3, %v258_v1 }
  0xed   :  { %v462_v6 = vmul.f32 0.5, %v454_v2 }
  0xee   :  { %v380_v22 = vadd.f32 %v379_v4, %v325_v5 }
  0xef   :  { %v470_v10 = vmul.f32 %v462_v6, %v423_v48 }
  0xf0   :  { %v431_v13 = vadd.f32 %v430_v9, %v380_v22 }
  0xf1   :  { %v478_v14 = vmul.f32 1.6666666, %v470_v10 }
  0xf2   :  { %v512_v17 = vpop.eup %511  ;;  %v440_v18 = vmul.f32 0.5, %v431_v13 }
  0xf3   :  { %487 = vst.msk [vmem:[%s723_s3 + $0x28] sm:$0xff] %vm481_vm2, %v478_v14  ;;  %v455_v21 = vadd.f32 1.0, %v512_v17 }
  0xf4   :  { %513 = vtanh.f32 %v440_v18 }
  0xf5   :  { %v463_v23 = vmul.f32 0.5, %v455_v21 }
  0xf7   :  { %v471_v24 = vmul.f32 %v463_v23, %v427_v62 }
  0xf9   :  { %v479_v7 = vmul.f32 1.6666666, %v471_v24 }
  0xfa   :  { %v514_v25 = vpop.eup %513 }
  0xfb   :  { %488 = vst.msk [vmem:[%s723_s3 + $0x30] sm:$0xff] %vm481_vm2, %v479_v7  ;;  %v456_v26 = vadd.f32 1.0, %v514_v25 }
  0xfd   :  { %v464_v27 = vmul.f32 0.5, %v456_v26 }
  0xff   :  { %v472_v28 = vmul.f32 %v464_v27, %v431_v13 }
 0x101   :  { %v480_v29 = vmul.f32 1.6666666, %v472_v28 }
 0x103   :  { %489 = vst.msk [vmem:[%s723_s3 + $0x38] sm:$0xff] %vm481_vm2, %v480_v29 }

</bundles_post_ra>
